<compile_context>
chip_gen: v7x
topology: tpu7x:2x2x1
jax: 0.10.0
libtpu: 0.0.40
codegen_flags: <defaults>
</compile_context>

<pallas_src>
import jax
import jax.numpy as jnp
from jax.experimental import pallas as pl
from jax.experimental.pallas import tpu as pltpu

_LANE = 128          # vreg lane width (batch maps onto lanes)
_SUBLANE = 8         # f32 sublane granularity (row tiles are multiples of 8)
_ROW_TILE_MAX = 1024  # rows of 128 lanes per grid step (~2 MiB streamed/step)


def _round_up(n, m):
    return ((n + m - 1) // m) * m


def _choose_row_tile(rows):
    """Rows (of 128 lanes each) per grid step.

    Big enough to amortize the ~0.35 us per-step pipeline overhead, small
    enough to (a) keep >= 2 grid steps when the batch allows it (so the
    "parallel" axis can shard across v7x's two TensorCores) and (b) bound
    double-buffered VMEM to ~4 MiB at the 1024-row cap (safe on v7x).
    """
    if rows <= _SUBLANE:
        return _SUBLANE
    half = _round_up(pl.cdiv(rows, 2), _SUBLANE)
    return min(_ROW_TILE_MAX, half)


def _mlp_kernel(p_ref, x_ref, o_ref):
    """Fused MLP forward on dense (R_tile, 128) tiles. Pure VPU/EUP, no MXU.

    p_ref : SMEM (11,) f32 packed params, row-major:
            [w1[0,0], w1[0,1], w1[1,0], w1[1,1], w1[2,0], w1[2,1],
             b1[0],   b1[1],   w2[0,0], w2[1,0], b2[0]]
    x_ref : VMEM (3, R_tile, 128) f32 -- three feature planes of the batch
    o_ref : VMEM (R_tile, 128)    f32 -- logits, one per batch lane
    """
    x0 = x_ref[0]   # (R_tile, 128) fully dense tiles
    x1 = x_ref[1]
    x2 = x_ref[2]

    # Hidden layer Linear(3, 2), unrolled as scalar-broadcast FMAs on the VPU.
    h0 = x0 * p_ref[0] + x1 * p_ref[2] + x2 * p_ref[4] + p_ref[6]
    h1 = x0 * p_ref[1] + x1 * p_ref[3] + x2 * p_ref[5] + p_ref[7]

    # SiLU(x) = x * sigmoid(x)  (sigmoid -> EUP slot, mul -> VPU slot)
    h0 = h0 * jax.nn.sigmoid(h0)
    h1 = h1 * jax.nn.sigmoid(h1)

    # Dropout(p=0.2): identity in eval/inference mode.
    # TODO(synk): training-mode dropout (pltpu.prng_seed + prng_random_bits
    # Bernoulli masking with 1/(1-p) scaling) is not implemented.

    # Output layer Linear(2, 1), unrolled.
    o_ref[...] = h0 * p_ref[8] + h1 * p_ref[9] + p_ref[10]


def neural_network_forward(x, w1, b1, w2, b2):
    """Runs the fused MLP as a single batch-tiled Pallas kernel.

    x : (B, 3) float32
    w1: (3, 2) float32   (torch Linear(3,2).weight transposed)
    b1: (2,)   float32
    w2: (2, 1) float32   (torch Linear(2,1).weight transposed)
    b2: (1,)   float32
    returns: (B, 1) float32 logits
    """
    B = x.shape[0]

    # Pack the 11 parameters into one SMEM-resident vector.
    params = jnp.concatenate(
        [w1.reshape(-1), b1.reshape(-1), w2.reshape(-1), b2.reshape(-1)]
    ).astype(jnp.float32)

    rows = pl.cdiv(B, _LANE)
    r_tile = _choose_row_tile(rows)
    rows_pad = _round_up(rows, r_tile)
    b_pad = rows_pad * _LANE

    # Feature-major, fully dense packing: (B, 3) -> (3, rows_pad, 128).
    # transpose + zero-pad fuse into one XLA copy pass; the reshape is a
    # layout-preserving split of the padded batch axis.
    xt = jnp.transpose(x.astype(jnp.float32))        # (3, B)
    if b_pad != B:
        xt = jnp.pad(xt, ((0, 0), (0, b_pad - B)))
    xp = xt.reshape(3, rows_pad, _LANE)

    out = pl.pallas_call(
        _mlp_kernel,
        out_shape=jax.ShapeDtypeStruct((rows_pad, _LANE), jnp.float32),
        grid=(rows_pad // r_tile,),
        in_specs=[
            # Packed params live in SMEM (no padded VMEM tiles / per-step DMAs).
            pl.BlockSpec(memory_space=pltpu.MemorySpace.SMEM),
            # Streaming, batch-tiled dense input (double-buffered by Pallas).
            pl.BlockSpec((3, r_tile, _LANE), lambda i: (0, i, 0)),
        ],
        out_specs=pl.BlockSpec((r_tile, _LANE), lambda i: (i, 0)),
        compiler_params=pltpu.CompilerParams(
            dimension_semantics=("parallel",),
            vmem_limit_bytes=32 * 1024 * 1024,
        ),
    )(params, xp)

    # Back to the PyTorch (B, 1) layout, dropping batch padding.
    return out.reshape(-1)[:B].reshape(B, 1)


def _reference_forward(x, w1, b1, w2, b2):
    """Pure-JAX reference for correctness checking (eval-mode dropout)."""
    h = x @ w1 + b1
    h = h * jax.nn.sigmoid(h)
    return h @ w2 + b2


if __name__ == "__main__":
    key = jax.random.PRNGKey(0)
    k_x, k_w1, k_b1, k_w2, k_b2 = jax.random.split(key, 5)

    # Deterministic synthetic parameters (shapes match the module __init__).
    w1 = jax.random.normal(k_w1, (3, 2), dtype=jnp.float32) * 0.5
    b1 = jax.random.normal(k_b1, (2,), dtype=jnp.float32) * 0.1
    w2 = jax.random.normal(k_w2, (2, 1), dtype=jnp.float32) * 0.5
    b2 = jax.random.normal(k_b2, (1,), dtype=jnp.float32) * 0.1

    fwd = jax.jit(neural_network_forward)

    # Primary small-batch check.
    B = 8
    x = jax.random.normal(k_x, (B, 3), dtype=jnp.float32)
    out = jax.block_until_ready(fwd(x, w1, b1, w2, b2))
    ref = _reference_forward(x, w1, b1, w2, b2)
    assert out.shape == (B, 1), out.shape
    assert jnp.allclose(out, ref, atol=1e-5, rtol=1e-5), (out, ref)

    # Batch that is not a multiple of 8/128 (exercises zero-padding).
    B2 = 200
    x2 = jax.random.normal(k_x, (B2, 3), dtype=jnp.float32)
    out2 = jax.block_until_ready(fwd(x2, w1, b1, w2, b2))
    ref2 = _reference_forward(x2, w1, b1, w2, b2)
    assert out2.shape == (B2, 1), out2.shape
    assert jnp.allclose(out2, ref2, atol=1e-5, rtol=1e-5)

    # Batch large enough to exercise a multi-step (>=2) grid.
    B3 = 2176
    x3 = jax.random.normal(k_x, (B3, 3), dtype=jnp.float32)
    out3 = jax.block_until_ready(fwd(x3, w1, b1, w2, b2))
    ref3 = _reference_forward(x3, w1, b1, w2, b2)
    assert out3.shape == (B3, 1), out3.shape
    assert jnp.allclose(out3, ref3, atol=1e-5, rtol=1e-5)

    print("KERNEL_OK")
</pallas_src>

<mosaic_0001>
module attributes {stable_mosaic.version = 11 : i64} {
  func.func @_mlp_kernel(%arg0: i32, %arg1: memref<11xf32, #tpu.memory_space<smem>>, %arg2: memref<3x8x128xf32, #tpu.memory_space<vmem>>, %arg3: memref<8x128xf32, #tpu.memory_space<vmem>>) attributes {dimension_semantics = [#tpu.dimension_semantics<parallel>], iteration_bounds = array<i64: 1>, scalar_prefetch = 0 : i64, scratch_operands = 0 : i64, tpu.core_type = #tpu.core_type<tc>, window_params = [{transform_indices = @transform_0, window_bounds = array<i64: 11>}, {transform_indices = @transform_1, window_bounds = array<i64: 3, 8, 128>}, {transform_indices = @transform_2, window_bounds = array<i64: 8, 128>}]} {
    %c0 = arith.constant 0 : index
    %c0_0 = arith.constant 0 : index
    %c0_1 = arith.constant 0 : index
    %0 = vector.load %arg2[%c0, %c0_0, %c0_1] : memref<3x8x128xf32, #tpu.memory_space<vmem>>, vector<1x8x128xf32>
    %1 = vector.shape_cast %0 : vector<1x8x128xf32> to vector<8x128xf32>
    %c1 = arith.constant 1 : index
    %c0_2 = arith.constant 0 : index
    %c0_3 = arith.constant 0 : index
    %2 = vector.load %arg2[%c1, %c0_2, %c0_3] : memref<3x8x128xf32, #tpu.memory_space<vmem>>, vector<1x8x128xf32>
    %3 = vector.shape_cast %2 : vector<1x8x128xf32> to vector<8x128xf32>
    %c2 = arith.constant 2 : index
    %c0_4 = arith.constant 0 : index
    %c0_5 = arith.constant 0 : index
    %4 = vector.load %arg2[%c2, %c0_4, %c0_5] : memref<3x8x128xf32, #tpu.memory_space<vmem>>, vector<1x8x128xf32>
    %5 = vector.shape_cast %4 : vector<1x8x128xf32> to vector<8x128xf32>
    %c0_6 = arith.constant 0 : index
    %6 = memref.load %arg1[%c0_6] : memref<11xf32, #tpu.memory_space<smem>>
    %7 = vector.broadcast %6 : f32 to vector<8x128xf32>
    %8 = arith.mulf %1, %7 : vector<8x128xf32>
    %c2_7 = arith.constant 2 : index
    %9 = memref.load %arg1[%c2_7] : memref<11xf32, #tpu.memory_space<smem>>
    %10 = vector.broadcast %9 : f32 to vector<8x128xf32>
    %11 = arith.mulf %3, %10 : vector<8x128xf32>
    %12 = arith.addf %8, %11 : vector<8x128xf32>
    %c4 = arith.constant 4 : index
    %13 = memref.load %arg1[%c4] : memref<11xf32, #tpu.memory_space<smem>>
    %14 = vector.broadcast %13 : f32 to vector<8x128xf32>
    %15 = arith.mulf %5, %14 : vector<8x128xf32>
    %16 = arith.addf %12, %15 : vector<8x128xf32>
    %c6 = arith.constant 6 : index
    %17 = memref.load %arg1[%c6] : memref<11xf32, #tpu.memory_space<smem>>
    %18 = vector.broadcast %17 : f32 to vector<8x128xf32>
    %19 = arith.addf %16, %18 : vector<8x128xf32>
    %c1_8 = arith.constant 1 : index
    %20 = memref.load %arg1[%c1_8] : memref<11xf32, #tpu.memory_space<smem>>
    %21 = vector.broadcast %20 : f32 to vector<8x128xf32>
    %22 = arith.mulf %1, %21 : vector<8x128xf32>
    %c3 = arith.constant 3 : index
    %23 = memref.load %arg1[%c3] : memref<11xf32, #tpu.memory_space<smem>>
    %24 = vector.broadcast %23 : f32 to vector<8x128xf32>
    %25 = arith.mulf %3, %24 : vector<8x128xf32>
    %26 = arith.addf %22, %25 : vector<8x128xf32>
    %c5 = arith.constant 5 : index
    %27 = memref.load %arg1[%c5] : memref<11xf32, #tpu.memory_space<smem>>
    %28 = vector.broadcast %27 : f32 to vector<8x128xf32>
    %29 = arith.mulf %5, %28 : vector<8x128xf32>
    %30 = arith.addf %26, %29 : vector<8x128xf32>
    %c7 = arith.constant 7 : index
    %31 = memref.load %arg1[%c7] : memref<11xf32, #tpu.memory_space<smem>>
    %32 = vector.broadcast %31 : f32 to vector<8x128xf32>
    %33 = arith.addf %30, %32 : vector<8x128xf32>
    %34 = arith.negf %19 : vector<8x128xf32>
    %35 = math.exp %34 : vector<8x128xf32>
    %cst = arith.constant 1.000000e+00 : f32
    %36 = vector.broadcast %cst : f32 to vector<8x128xf32>
    %37 = arith.addf %36, %35 : vector<8x128xf32>
    %38 = arith.divf %36, %37 : vector<8x128xf32>
    %39 = arith.mulf %19, %38 : vector<8x128xf32>
    %40 = arith.negf %33 : vector<8x128xf32>
    %41 = math.exp %40 : vector<8x128xf32>
    %cst_9 = arith.constant 1.000000e+00 : f32
    %42 = vector.broadcast %cst_9 : f32 to vector<8x128xf32>
    %43 = arith.addf %42, %41 : vector<8x128xf32>
    %44 = arith.divf %42, %43 : vector<8x128xf32>
    %45 = arith.mulf %33, %44 : vector<8x128xf32>
    %c8 = arith.constant 8 : index
    %46 = memref.load %arg1[%c8] : memref<11xf32, #tpu.memory_space<smem>>
    %47 = vector.broadcast %46 : f32 to vector<8x128xf32>
    %48 = arith.mulf %39, %47 : vector<8x128xf32>
    %c9 = arith.constant 9 : index
    %49 = memref.load %arg1[%c9] : memref<11xf32, #tpu.memory_space<smem>>
    %50 = vector.broadcast %49 : f32 to vector<8x128xf32>
    %51 = arith.mulf %45, %50 : vector<8x128xf32>
    %52 = arith.addf %48, %51 : vector<8x128xf32>
    %c10 = arith.constant 10 : index
    %53 = memref.load %arg1[%c10] : memref<11xf32, #tpu.memory_space<smem>>
    %54 = vector.broadcast %53 : f32 to vector<8x128xf32>
    %55 = arith.addf %52, %54 : vector<8x128xf32>
    %c0_10 = arith.constant 0 : index
    %c0_11 = arith.constant 0 : index
    %56 = vector.load %arg3[%c0_10, %c0_11] : memref<8x128xf32, #tpu.memory_space<vmem>>, vector<8x128xf32>
    tpu.vector_store %arg3[%c0_10, %c0_11], %55 {strides = array<i32>} : memref<8x128xf32, #tpu.memory_space<vmem>>, vector<8x128xf32>,
    return
  }
  func.func @transform_0(%arg0: i32) -> i32 {
    %c0_i32 = arith.constant 0 : i32
    %c0_i32_0 = arith.constant 0 : i32
    return %c0_i32 : i32
  }
  func.func @transform_1(%arg0: i32) -> (i32, i32, i32) {
    %c0_i32 = arith.constant 0 : i32
    %c0_i32_0 = arith.constant 0 : i32
    %c0_i32_1 = arith.constant 0 : i32
    return %c0_i32, %arg0, %c0_i32_0 : i32, i32, i32
  }
  func.func @transform_2(%arg0: i32) -> (i32, i32) {
    %c0_i32 = arith.constant 0 : i32
    %c0_i32_0 = arith.constant 0 : i32
    return %arg0, %c0_i32 : i32, i32
  }
}

</mosaic_0001>

<bundles_post_ra>
// kernel: neural_network_forward.1
= control target key start
LH: loop header
LB: loop body
LE: loop exit
PB: predicated region body
PF: predicated region fallthrough
CT: control target
= control target key end

     0   :  { %7 = vsyncpa [#allocation3], 0  ;;  %s155_s0 = inlined_call_operand.vmem [shape: f32[11], index: 0, kind: input, shape index: {}]   ;;  %s156_s1 = inlined_call_operand.vmem [shape: f32[3,8,128], index: 1, kind: input, shape index: {}]   ;;  %s157_s2 = inlined_call_operand.vmem [shape: f32[8,128], index: 2, kind: output, shape index: {}]  }
   0x1   :  { %s14_s11 = sshll.u32 %s155_s0, 4  ;;  %s15_s11 = int_to_ptr.vmem [resolvable:$true] %s14_s11 }
   0x2   :  { %s110_s12 = scalar_lea.vmem %s15_s11, 16  ;;  %p115_p1 = scmp.lt.s32.totalorder %s15_s11, %s15_s11 }
   0x3   :  { %p111_p0 = scmp.ne.s32.totalorder %s15_s11, %s110_s12  ;;  %p116_p2 = scmp.lt.s32.totalorder %s110_s12, %s110_s12 }
   0x5   :  { %p117_p3 = por %p116_p2, %p115_p1 }
   0x7   :  { %p118_p4 = pnand %p117_p3, %p111_p0 }
   0x9   :  { %121 = shalt.err (!%p118_p4)
}
   0xa   :  { %s124_s13 = smov [#allocation2]  }
   0xb   :  { %17 = dma.vmem_to_smem %s15_s11, 16, %s124_s13, [#allocation3]  }
   0xc   :  { %122 = dma.done.wait [#allocation3], 16  }
   0xd   :  { %123 = vsyncadd [#allocation3], 4294967280 }
   0xe   :  { %23 = sfence }
   0xf   :  { %s29_s14 = sld [smem:[#allocation2]]  ;;  %s89_s15 = sld [smem:[#allocation2 + $0x2]]  ;;  %v24_v0 = vld [vmem:[%s156_s1] sm:$0xff]  ;;  %v87_v1 = vld [vmem:[%s156_s1 + $0x8] sm:$0xff]  ;;  %v88_v2 = vld [vmem:[%s156_s1 + $0x10] sm:$0xff] }
  0x10   :  { %s90_s16 = sld [smem:[#allocation2 + $0x4]]  ;;  %s91_s17 = sld [smem:[#allocation2 + $0x6]] }
  0x11   :  { %s92_s18 = sld [smem:[#allocation2 + $0x1]]  ;;  %s93_s19 = sld [smem:[#allocation2 + $0x3]] }
  0x12   :  { %s94_s0 = sld [smem:[#allocation2 + $0x5]]  ;;  %s95_s26 = sld [smem:[#allocation2 + $0x7]] }
  0x13   :  { %s98_s1 = sld [smem:[#allocation2 + $0x8]]  ;;  %s99_s27 = sld [smem:[#allocation2 + $0x9]] }
  0x14   :  { %s100_s28 = sld [smem:[#allocation2 + $0xa]] }
  0x15   :  { %v30_v3 = vstv %s29_s14  ;;  %v33_v5 = vstv %s89_s15 }
  0x16   :  { %v31_v4 = vmul.f32 %v30_v3, %v24_v0  ;;  %v37_v6 = vstv %s90_s16  ;;  %v34_v7 = vmul.f32 %v87_v1, %v33_v5  ;;  %v41_v16 = vstv %s91_s17 }
  0x17   :  { %v38_v8 = vmul.f32 %v88_v2, %v37_v6  ;;  %v44_v9 = vstv %s92_s18  ;;  %v47_v11 = vstv %s93_s19 }
  0x18   :  { %v45_v10 = vmul.f32 %v44_v9, %v24_v0  ;;  %v51_v12 = vstv %s94_s0  ;;  %v35_v13 = vadd.f32 %v34_v7, %v31_v4  ;;  %v48_v14 = vmul.f32 %v87_v1, %v47_v11 }
  0x19   :  { %v52_v15 = vmul.f32 %v88_v2, %v51_v12  ;;  %v55_v19 = vstv %s95_s26  ;;  %v72_v30 = vstv %s98_s1  ;;  %v75_v33 = vstv %s99_s27 }
  0x1a   :  { %v39_v17 = vadd.f32 %v38_v8, %v35_v13  ;;  %v49_v18 = vadd.f32 %v48_v14, %v45_v10  ;;  %v79_v37 = vstv %s100_s28 }
  0x1c   :  { %v42_v20 = vadd.f32 %v41_v16, %v39_v17  ;;  %v53_v21 = vadd.f32 %v52_v15, %v49_v18 }
  0x1e   :  { %v56_v22 = vadd.f32 %v55_v19, %v53_v21  ;;  %v96_v23 = vmul.f32 -1.442695, %v42_v20 }
  0x20   :  { %102 = vpow2.f32 %v96_v23  ;;  %v97_v24 = vmul.f32 -1.442695, %v56_v22 }
  0x22   :  { %104 = vpow2.f32 %v97_v24 }
  0x2a   :  { %v103_v25 = vpop.eup %102 }
  0x2b   :  { %v60_v26 = vadd.f32 1.0, %v103_v25 }
  0x2c   :  { %v105_v27 = vpop.eup %104 }
  0x2d   :  { %106 = vrcp.f32 %v60_v26  ;;  %v67_v28 = vadd.f32 1.0, %v105_v27 }
  0x2f   :  { %108 = vrcp.f32 %v67_v28 }
  0x37   :  { %v107_v29 = vpop.eup %106 }
  0x38   :  { %v63_v31 = vmul.f32 %v107_v29, %v42_v20 }
  0x39   :  { %v109_v32 = vpop.eup %108 }
  0x3a   :  { %v70_v34 = vmul.f32 %v109_v32, %v56_v22  ;;  %v73_v35 = vmul.f32 %v72_v30, %v63_v31 }
  0x3c   :  { %v76_v36 = vmul.f32 %v75_v33, %v70_v34 }
  0x3e   :  { %v77_v38 = vadd.f32 %v76_v36, %v73_v35 }
  0x40   :  { %v80_v39 = vadd.f32 %v79_v37, %v77_v38 }
  0x42   :  { %81 = vst [vmem:[%s157_s2] sm:$0xff] %v80_v39 }
  0x43   :  { %86 = vsyncpa [#allocation3], 1 }

</bundles_post_ra>
